<compile_context>
chip_gen: v5e
topology: v5e:2x2
jax: 0.10.0
libtpu: 0.0.40
codegen_flags: <defaults>
</compile_context>

<pallas_src>
import jax
import jax.numpy as jnp
from jax.experimental import pallas as pl
from jax.experimental.pallas import tpu as pltpu


def tangnet_kernel(loc_ref, feat_ref, wl_ref, bl_ref, wc_ref, bc_ref, out_ref):
    # fc_loc + sigmoid (f32 accumulate, f32 activation).
    h = jnp.dot(loc_ref[...], wl_ref[...],
                preferred_element_type=jnp.float32) + bl_ref[...]
    h = jax.nn.sigmoid(h)

    # Build cat((x, net_feat), 1) in f32, then feed the MXU in the weight
    # dtype (bf16 by default) with a single K = loc_dim + feats_dim matmul.
    xcat = jnp.concatenate([h, feat_ref[...].astype(jnp.float32)], axis=1)
    logits = jnp.dot(xcat.astype(wc_ref.dtype), wc_ref[...],
                     preferred_element_type=jnp.float32) + bc_ref[...]

    # log_softmax along dim=1 (numerically stable), in f32.
    m = jnp.max(logits, axis=1, keepdims=True)
    z = logits - m
    lse = jnp.log(jnp.sum(jnp.exp(z), axis=1, keepdims=True))
    out_ref[...] = (z - lse).astype(out_ref.dtype)


def tangnet_forward(loc, net_feat, params, *, use_loc=True, tile_b=512,
                    compute_dtype=jnp.bfloat16):
    """Pallas-backed TangNet.forward (use_loc=True path).

    tile_b: batch rows per grid step (multiple of 8; 512 is a multiple of both
            128 (v5e MXU rows) and 256 (v6e/v7x MXU rows)).
    compute_dtype: dtype of the MXU operands; accumulation stays f32.
    """
    if not use_loc:
        # TODO(synk): use_loc=False path is just log_softmax(fc_class(net_feat));
        # not exercised here.
        raise NotImplementedError("only use_loc=True is wired up")

    wl, bl, wc, bc = params
    B, ip_loc_dim = loc.shape
    feats_dim = net_feat.shape[1]
    loc_dim = wl.shape[1]
    num_classes = bc.shape[1]
    assert wc.shape == (loc_dim + feats_dim, num_classes)

    # Batch tile: full batch if small, otherwise a multiple of 8 (sublane rule).
    if B <= tile_b:
        tile_b = B
    else:
        tile_b = max(8, (tile_b // 8) * 8)
    grid = (pl.cdiv(B, tile_b),)

    # Narrow the MXU operands; keep biases (and all post-matmul math) in f32.
    loc_c = loc.astype(compute_dtype)
    feat_c = net_feat.astype(compute_dtype)
    wl_c = wl.astype(compute_dtype)
    wc_c = wc.astype(compute_dtype)
    bl_f = bl.astype(jnp.float32)
    bc_f = bc.astype(jnp.float32)

    return pl.pallas_call(
        tangnet_kernel,
        out_shape=jax.ShapeDtypeStruct((B, num_classes), jnp.float32),
        grid=grid,
        in_specs=[
            # Batch-tiled activations (auto double-buffered by Pallas).
            pl.BlockSpec((tile_b, ip_loc_dim), lambda i: (i, 0)),
            pl.BlockSpec((tile_b, feats_dim), lambda i: (i, 0)),
            # Weights/biases: full arrays, resident across the grid.
            pl.BlockSpec((ip_loc_dim, loc_dim), lambda i: (0, 0)),
            pl.BlockSpec((1, loc_dim), lambda i: (0, 0)),
            pl.BlockSpec((loc_dim + feats_dim, num_classes), lambda i: (0, 0)),
            pl.BlockSpec((1, num_classes), lambda i: (0, 0)),
        ],
        out_specs=pl.BlockSpec((tile_b, num_classes), lambda i: (i, 0)),
        compiler_params=pltpu.CompilerParams(
            dimension_semantics=("parallel",)),  # megacore split on v7x
    )(loc_c, feat_c, wl_c, bl_f, wc_c, bc_f)


def init_params(key, ip_loc_dim, feats_dim, loc_dim, num_classes):
    """Deterministic init mimicking nn.Linear's U(-1/sqrt(fan_in), 1/sqrt(fan_in))."""
    k1, k2, k3, k4 = jax.random.split(key, 4)

    def uni(k, shape, fan_in):
        b = 1.0 / jnp.sqrt(jnp.float32(fan_in))
        return jax.random.uniform(k, shape, jnp.float32, minval=-b, maxval=b)

    # fc_loc: [ip_loc_dim -> loc_dim], stored as [in, out].
    wl = uni(k1, (ip_loc_dim, loc_dim), ip_loc_dim)
    bl = uni(k2, (1, loc_dim), ip_loc_dim)
    # fc_class: [loc_dim + feats_dim -> num_classes], single merged weight;
    # first loc_dim rows correspond to the x part of torch.cat((x, net_feat), 1).
    fan = loc_dim + feats_dim
    wc = uni(k3, (loc_dim + feats_dim, num_classes), fan)
    bc = uni(k4, (1, num_classes), fan)
    return wl, bl, wc, bc


def tangnet_reference(loc, net_feat, params, compute_dtype=jnp.float32):
    """Pure-JAX reference. compute_dtype mirrors the kernel's MXU-operand cast."""
    wl, bl, wc, bc = params
    h = jnp.dot(loc.astype(compute_dtype), wl.astype(compute_dtype),
                preferred_element_type=jnp.float32) + bl
    h = jax.nn.sigmoid(h)
    xcat = jnp.concatenate([h, net_feat.astype(jnp.float32)], axis=1)
    logits = jnp.dot(xcat.astype(compute_dtype), wc.astype(compute_dtype),
                     preferred_element_type=jnp.float32) + bc
    return jax.nn.log_softmax(logits, axis=1)


if __name__ == "__main__":
    # Small shapes consistent with the module's forward; tile_b=16 exercises a
    # multi-step batch grid (grid=(4,)) on these toy shapes.
    B = 64
    ip_loc_dim = 16
    feats_dim = 32
    loc_dim = 32
    num_classes = 128

    key = jax.random.PRNGKey(0)
    kp, kloc, kfeat = jax.random.split(key, 3)

    params = init_params(kp, ip_loc_dim, feats_dim, loc_dim, num_classes)
    loc = jax.random.normal(kloc, (B, ip_loc_dim), jnp.float32)
    net_feat = jax.random.normal(kfeat, (B, feats_dim), jnp.float32)

    out = tangnet_forward(loc, net_feat, params, use_loc=True, tile_b=16,
                          compute_dtype=jnp.bfloat16)
    out = jax.block_until_ready(out)

    # Matched-precision reference (same bf16 operand cast) -> tight tolerance.
    ref_match = jax.block_until_ready(
        tangnet_reference(loc, net_feat, params, compute_dtype=jnp.bfloat16))
    # Full-f32 reference -> loose tolerance (bf16 matmul operands only).
    ref_f32 = jax.block_until_ready(
        tangnet_reference(loc, net_feat, params, compute_dtype=jnp.float32))

    assert out.shape == (B, num_classes)
    assert jnp.allclose(out, ref_match, atol=1e-3, rtol=1e-3), \
        "mismatch vs matched-precision reference"
    assert jnp.allclose(out, ref_f32, atol=5e-2, rtol=5e-2), \
        "mismatch vs f32 reference"

    print("KERNEL_OK")
</pallas_src>

<mosaic_0001>
module attributes {stable_mosaic.version = 11 : i64} {
  func.func @tangnet_kernel(%arg0: i32, %arg1: memref<16x16xbf16, #tpu.memory_space<vmem>>, %arg2: memref<16x32xbf16, #tpu.memory_space<vmem>>, %arg3: memref<16x32xbf16, #tpu.memory_space<vmem>>, %arg4: memref<1x32xf32, #tpu.memory_space<vmem>>, %arg5: memref<64x128xbf16, #tpu.memory_space<vmem>>, %arg6: memref<1x128xf32, #tpu.memory_space<vmem>>, %arg7: memref<16x128xf32, #tpu.memory_space<vmem>>) attributes {dimension_semantics = [#tpu.dimension_semantics<parallel>], iteration_bounds = array<i64: 4>, scalar_prefetch = 0 : i64, scratch_operands = 0 : i64, tpu.core_type = #tpu.core_type<tc>, window_params = [{transform_indices = @transform_0, window_bounds = array<i64: 16, 16>}, {transform_indices = @transform_1, window_bounds = array<i64: 16, 32>}, {pipeline_mode = #tpu.pipeline_mode<synchronous>, transform_indices = @transform_2, window_bounds = array<i64: 16, 32>}, {pipeline_mode = #tpu.pipeline_mode<synchronous>, transform_indices = @transform_3, window_bounds = array<i64: 1, 32>}, {pipeline_mode = #tpu.pipeline_mode<synchronous>, transform_indices = @transform_4, window_bounds = array<i64: 64, 128>}, {pipeline_mode = #tpu.pipeline_mode<synchronous>, transform_indices = @transform_5, window_bounds = array<i64: 1, 128>}, {transform_indices = @transform_6, window_bounds = array<i64: 16, 128>}]} {
    %c0 = arith.constant 0 : index
    %c0_0 = arith.constant 0 : index
    %0 = vector.load %arg1[%c0, %c0_0] : memref<16x16xbf16, #tpu.memory_space<vmem>>, vector<16x16xbf16>
    %c0_1 = arith.constant 0 : index
    %c0_2 = arith.constant 0 : index
    %1 = vector.load %arg3[%c0_1, %c0_2] : memref<16x32xbf16, #tpu.memory_space<vmem>>, vector<16x32xbf16>
    %cst = arith.constant dense<0.000000e+00> : vector<16x32xf32>
    %2 = tpu.matmul %0, %1, %cst {dimension_numbers = #tpu.dot_dimension_numbers<[1], [0], [0], [1], [0, 0, 1, 1], [], []>} : vector<16x16xbf16>, vector<16x32xbf16>, vector<16x32xf32> -> vector<16x32xf32>
    %c0_3 = arith.constant 0 : index
    %c0_4 = arith.constant 0 : index
    %3 = vector.load %arg4[%c0_3, %c0_4] : memref<1x32xf32, #tpu.memory_space<vmem>>, vector<1x32xf32>
    %4 = vector.broadcast %3 : vector<1x32xf32> to vector<16x32xf32>
    %5 = arith.addf %2, %4 : vector<16x32xf32>
    %6 = arith.negf %5 : vector<16x32xf32>
    %7 = math.exp %6 : vector<16x32xf32>
    %cst_5 = arith.constant 1.000000e+00 : f32
    %8 = vector.broadcast %cst_5 : f32 to vector<16x32xf32>
    %9 = arith.addf %8, %7 : vector<16x32xf32>
    %10 = arith.divf %8, %9 : vector<16x32xf32>
    %c0_6 = arith.constant 0 : index
    %c0_7 = arith.constant 0 : index
    %11 = vector.load %arg2[%c0_6, %c0_7] : memref<16x32xbf16, #tpu.memory_space<vmem>>, vector<16x32xbf16>
    %12 = arith.extf %11 : vector<16x32xbf16> to vector<16x32xf32>
    %13 = tpu.concatenate %10, %12 in 1 : vector<16x32xf32>, vector<16x32xf32> -> vector<16x64xf32>
    %14 = arith.truncf %13 : vector<16x64xf32> to vector<16x64xbf16>
    %c0_8 = arith.constant 0 : index
    %c0_9 = arith.constant 0 : index
    %15 = vector.load %arg5[%c0_8, %c0_9] : memref<64x128xbf16, #tpu.memory_space<vmem>>, vector<64x128xbf16>
    %cst_10 = arith.constant dense<0.000000e+00> : vector<16x128xf32>
    %16 = tpu.matmul %14, %15, %cst_10 {dimension_numbers = #tpu.dot_dimension_numbers<[1], [0], [0], [1], [0, 0, 1, 1], [], []>} : vector<16x64xbf16>, vector<64x128xbf16>, vector<16x128xf32> -> vector<16x128xf32>
    %c0_11 = arith.constant 0 : index
    %c0_12 = arith.constant 0 : index
    %17 = vector.load %arg6[%c0_11, %c0_12] : memref<1x128xf32, #tpu.memory_space<vmem>>, vector<1x128xf32>
    %18 = vector.broadcast %17 : vector<1x128xf32> to vector<16x128xf32>
    %19 = arith.addf %16, %18 : vector<16x128xf32>
    %cst_13 = arith.constant dense<0xFF800000> : vector<16xf32>
    %20 = vector.multi_reduction <maximumf>, %19, %cst_13 [1] : vector<16x128xf32> to vector<16xf32>
    %21 = vector.shape_cast %20 : vector<16xf32> to vector<16x1xf32>
    %22 = vector.broadcast %21 : vector<16x1xf32> to vector<16x128xf32>
    %23 = arith.subf %19, %22 : vector<16x128xf32>
    %24 = math.exp %23 : vector<16x128xf32>
    %cst_14 = arith.constant dense<0.000000e+00> : vector<16xf32>
    %25 = vector.multi_reduction <add>, %24, %cst_14 [1] : vector<16x128xf32> to vector<16xf32>
    %26 = vector.shape_cast %25 : vector<16xf32> to vector<16x1xf32>
    %27 = math.log %26 : vector<16x1xf32>
    %28 = vector.broadcast %27 : vector<16x1xf32> to vector<16x128xf32>
    %29 = arith.subf %23, %28 : vector<16x128xf32>
    %c0_15 = arith.constant 0 : index
    %c0_16 = arith.constant 0 : index
    %30 = vector.load %arg7[%c0_15, %c0_16] : memref<16x128xf32, #tpu.memory_space<vmem>>, vector<16x128xf32>
    tpu.vector_store %arg7[%c0_15, %c0_16], %29 {strides = array<i32>} : memref<16x128xf32, #tpu.memory_space<vmem>>, vector<16x128xf32>,
    return
  }
  func.func @transform_0(%arg0: i32) -> (i32, i32) {
    %c0_i32 = arith.constant 0 : i32
    %c0_i32_0 = arith.constant 0 : i32
    return %arg0, %c0_i32 : i32, i32
  }
  func.func @transform_1(%arg0: i32) -> (i32, i32) {
    %c0_i32 = arith.constant 0 : i32
    %c0_i32_0 = arith.constant 0 : i32
    return %arg0, %c0_i32 : i32, i32
  }
  func.func @transform_2(%arg0: i32) -> (i32, i32) {
    %c0_i32 = arith.constant 0 : i32
    %c0_i32_0 = arith.constant 0 : i32
    %c0_i32_1 = arith.constant 0 : i32
    return %c0_i32, %c0_i32_0 : i32, i32
  }
  func.func @transform_3(%arg0: i32) -> (i32, i32) {
    %c0_i32 = arith.constant 0 : i32
    %c0_i32_0 = arith.constant 0 : i32
    %c0_i32_1 = arith.constant 0 : i32
    return %c0_i32, %c0_i32_0 : i32, i32
  }
  func.func @transform_4(%arg0: i32) -> (i32, i32) {
    %c0_i32 = arith.constant 0 : i32
    %c0_i32_0 = arith.constant 0 : i32
    %c0_i32_1 = arith.constant 0 : i32
    return %c0_i32, %c0_i32_0 : i32, i32
  }
  func.func @transform_5(%arg0: i32) -> (i32, i32) {
    %c0_i32 = arith.constant 0 : i32
    %c0_i32_0 = arith.constant 0 : i32
    %c0_i32_1 = arith.constant 0 : i32
    return %c0_i32, %c0_i32_0 : i32, i32
  }
  func.func @transform_6(%arg0: i32) -> (i32, i32) {
    %c0_i32 = arith.constant 0 : i32
    %c0_i32_0 = arith.constant 0 : i32
    return %arg0, %c0_i32 : i32, i32
  }
}

</mosaic_0001>

<bundles_post_ra>
// kernel: tpu_custom_call.1
= control target key start
LH: loop header
LB: loop body
LE: loop exit
PB: predicated region body
PF: predicated region fallthrough
CT: control target
= control target key end

     0   :  { %11 = vsyncpa [#allocation3], 0  ;;  %s861_s0 = inlined_call_operand.vmem [shape: bf16[64,16], index: 0, kind: input, shape index: {}]   ;;  %s862_s1 = inlined_call_operand.vmem [shape: bf16[64,32], index: 1, kind: input, shape index: {}]   ;;  %s863_s2 = inlined_call_operand.vmem [shape: bf16[16,32], index: 2, kind: input, shape index: {}]   ;;  %s864_s3 = inlined_call_operand.vmem [shape: f32[1,32], index: 3, kind: input, shape index: {}]   ;;  %s865_s4 = inlined_call_operand.vmem [shape: bf16[64,128], index: 4, kind: input, shape index: {}]   ;;  %s866_s5 = inlined_call_operand.vmem [shape: f32[1,128], index: 5, kind: input, shape index: {}]   ;;  %s867_s6 = inlined_call_operand.hbm [shape: f32[64,128], index: 6, kind: output, shape index: {}]  }
   0x1   :  { %13 = vsyncpa [#allocation3 + $0x1], 0  ;;  %s753_s21 = smov 0   ;;  %s755_s22 = smov 0  }
   0x2   :  { %s757_s23 = smov 0   ;;  %s759_s24 = smov 0  }
   0x3 LB: > { %s774_s25 = sadd.s32 4294967295, %s713_s24   ;;  %s533_s26 = sadd.s32 4294967294, %s713_s24   ;;  %s713_s24 = sphi %s759_s24, %s873_s24   ;;  %s709_s23 = sphi %s757_s23, %s872_s23   ;;  %s705_s22 = sphi %s755_s22, %s871_s22   ;;  %s701_s21 = sphi %s753_s21, %s870_s21  }
   0x4   : > { %s778_s27 = sadd.s32 1, %s713_s24   ;;  %s162_s28 = sadd.s32 1, %s709_s23 }
   0x5   : > { %s159_s29 = ssub.s32 %s713_s24, %s778_s27  ;;  %p172_p0 = scmp.ne.s32.totalorder %s709_s23, %s705_s22 }
   0x6   : > { %p160_p1 = scmp.eq.s32.totalorder %s159_s29, 0  ;;  %p173_p2 = scmp.eq.s32.totalorder %s774_s25, 3 }
   0x7   : > { %p178_p3 = scmp.ne.s32.totalorder %s705_s22, %s701_s21  ;;  %p179_p4 = scmp.eq.s32.totalorder %s533_s26, 3 }
   0x8   : > { %s789_s30 = scalar_select %p160_p1, %s709_s23, %s162_s28  }
   0x9   : > { %p791_p5 = por %p173_p2, %p172_p0  ;;  %p795_p6 = por %p179_p4, %p178_p3 }
   0xa   : > { %p536_p7 = scmp.ge.s32.totalorder %s713_s24, 1  ;;  %p227_p8 = scmp.lt.s32.totalorder %s713_s24, 5 }
   0xc   : > { %p228_p9 = pnand %p536_p7, %p227_p8 }
   0xd   : > { %s538_s11 = sshll.u32 (!%p228_p9), %s774_s25, 1  ;;  %s715_s19 = smov (!%p228_p9), 32  }
   0xe   : > { %231 = sbr.rel (%p228_p9) target bundleno = 584 (0x248), region = 44  ;;  %p263_p10 = scmp.lt.s32.totalorder (!%p228_p9), %s538_s11, 7 }
   0xf   : > { %s259_s17 = sand.u32 (!%p228_p9), 1, %s705_s22  }
  0x13   : > { %v576_v0 = vld [vmem:[%s863_s2] sm:$0xff]  ;;  %s875_s11 = smov (!%p263_p10, %s538_s11), 7  ;;  %vm295_vm0 = vcmask 130048   ;;  %v580_v6 = vld [vmem:[%s865_s4 + $0x18] sm:$0xff]  ;;  %v579_v8 = vld [vmem:[%s865_s4 + $0x10] sm:$0xff]  ;;  %vm363_vm8 = vcmask 261120  }
  0x14   : > { %306 = vmatpush.bf16.msra.mxu0 %v576_v0  ;;  %s539_s12 = sshll.u32 %s875_s11, 2  ;;  %411 = vmatpush.bf16.msra.mxu1 %v580_v6  ;;  %v633_v7 = vld [vmem:[%s864_s3] ss:$0 sm:$0xff]  ;;  %v578_v9 = vld [vmem:[%s865_s4 + $0x8] sm:$0xff]  ;;  %vm403_vm10 = vcmask 523264   ;;  %s444_s11 = scalar_lea.sflag [#allocation3], %s259_s17 }
  0x15   : > { %s266_s15 = scalar_lea.vmem %s861_s0, %s539_s12  ;;  %s272_s18 = scalar_lea.vmem %s862_s1, %s539_s12  ;;  %v577_v13 = vld [vmem:[%s865_s4] sm:$0xff] }
  0x16   : > { %v575_v1 = vld [vmem:[%s266_s15] sm:$0xff]  ;;  %s671_s15 = scalar_lea.hbm %s867_s6, 64 }
  0x17   : > { %v583_v2 = vld [vmem:[%s272_s18] sm:$0xff]   ;;  %550 = vmatmul.msk.bf16.vlgmr.msra.gmra.mxu0 %vm295_vm0, %v575_v1  ;;  %s537_s18 = sshll.u32 %s259_s17, 4 }
  0x18   : > { %v584_v3 = vunpack.c.l.bf16 %v583_v2  ;;  %v585_v4 = vunpack.c.h.bf16 %v583_v2  ;;  %412 = vmatpush.bf16.msra.mxu1 %v579_v8  ;;  %v634_v47 = vld [vmem:[%s866_s5] ss:$0 sm:$0xff]  ;;  %s261_s29 = scalar_lea.vmem [#allocation2], %s537_s18 }
  0x19   : > { %s456_s9 = sshll.u32 %s261_s29, 4  ;;  %s457_s9 = int_to_ptr.vmem [resolvable:$true] %s456_s9 }
  0x1a   : > { %v628_v5 = vpack.i.bf16 %v585_v4, %v584_v3 }
  0x1c   : > { %629 = vrot.lane.b32.xlu0 %v628_v5, %s715_s19  ;;  %413 = vmatpush.bf16.msra.mxu1 %v578_v9  ;;  %s581_s19 = sshll.u32 %s774_s25, 4 }
  0x1d   : > { %s455_s28 = scalar_lea.hbm %s867_s6, %s581_s19 }
  0x1e   : > { %s458_s10 = sshll.u32 %s455_s28, 4  ;;  %s459_s10 = int_to_ptr.hbm [resolvable:$true] %s458_s10 }
  0x1f   : > { %s665_s12 = sshra.s32 %s459_s10, 4  ;;  %s666_s12 = int_to_ptr.hbm [resolvable:$true] %s665_s12 }
  0x20   : > { %414 = vmatpush.bf16.msra.mxu1 %v577_v13  ;;  %s667_s25 = scalar_lea.hbm %s666_s12, 16  ;;  %p672_p0 = scmp.lt.s32.totalorder %s666_s12, %s867_s6 }
  0x21   : > { %p668_p11 = scmp.ne.s32.totalorder %s666_s12, %s667_s25  ;;  %p673_p1 = scmp.lt.s32.totalorder %s671_s15, %s667_s25 }
  0x23   : > { %p669_p12 = pnand %p668_p11, %p791_p5  ;;  %p674_p2 = por %p673_p1, %p672_p0 }
  0x25   : > { %p670_p13 = pneg %p669_p12 }
  0x27   : > { %p675_p3 = pnand %p674_p2, %p670_p13 }
  0x8e   : > { %v630_v30 = vpop.permute.xlu0 %629 }
  0x8f   : > { %v631_v36 = vunpack.i.l.bf16 %v630_v30  ;;  %v632_v38 = vunpack.i.h.bf16 %v630_v30 }
  0x94   : > { %v308_v10 = vpop.f32.mrf.mxu0 }
  0x95   : > { %v309_v11 = vadd.f32 %v633_v7, %v308_v10 }
  0x97   : > { %v551_v12 = vmul.f32 -1.442695, %v309_v11 }
  0x99   : > { %635 = vpow2.f32 %v551_v12 }
  0x9c   : > { %v310_v14 = vpop.f32.mrf.mxu0 }
  0x9d   : > { %v311_v15 = vadd.f32 %v633_v7, %v310_v14 }
  0x9f   : > { %v636_v16 = vpop.eup %635  ;;  %v552_v17 = vmul.f32 -1.442695, %v311_v15 }
  0xa0   : > { %v319_v18 = vadd.f32 1.0, %v636_v16 }
  0xa1   : > { %637 = vpow2.f32 %v552_v17 }
  0xa2   : > { %639 = vrcp.f32 %v319_v18  ;;  %v332_v28 = vand.u32 2147483648, %v319_v18  ;;  %vm326_vm2 = vweird.f32 %v319_v18  ;;  %v330_v31 = vand.u32 2147483647, %v319_v18 }
  0xa4   : > { %v333_v37 = vor.u32 1.1754944e-38, %v332_v28  ;;  %vm331_vm5 = vcmp.eq.f32.partialorder %v330_v31, 8.507059e+37 }
  0xa7   : > { %v638_v19 = vpop.eup %637 }
  0xa8   : > { %v640_v20 = vpop.eup %639  ;;  %v320_v21 = vadd.f32 1.0, %v638_v19 }
  0xa9   : > { %v322_v22 = vmul.f32 %v640_v20, %v319_v18  ;;  %vm327_vm1 = vweird.f32 %v640_v20 }
  0xaa   : > { %641 = vrcp.f32 %v320_v21  ;;  %vm328_vm3 = vmor %vm326_vm2, %vm327_vm1  ;;  %v347_v32 = vand.u32 2147483648, %v320_v21  ;;  %v345_v35 = vand.u32 2147483647, %v320_v21  ;;  %vm341_vm6 = vweird.f32 %v320_v21 }
  0xab   : > { %v323_v23 = vsub.f32 1.0, %v322_v22 }
  0xac   : > { %v348_v41 = vor.u32 1.1754944e-38, %v347_v32  ;;  %vm346_vm9 = vcmp.eq.f32.partialorder %v345_v35, 8.507059e+37 }
  0xad   : > { %v324_v24 = vmul.f32 %v640_v20, %v323_v23 }
  0xaf   : > { %v325_v27 = vadd.f32 %v640_v20, %v324_v24 }
  0xb0   : > { %v642_v25 = vpop.eup %641 }
  0xb1   : > { %v337_v26 = vmul.f32 %v642_v25, %v320_v21  ;;  %v329_v33 = vsel %vm328_vm3, %v640_v20, %v325_v27  ;;  %vm342_vm4 = vweird.f32 %v642_v25 }
  0xb2   : > { %v334_v40 = vsel %vm331_vm5, %v333_v37, %v329_v33  ;;  %vm343_vm7 = vmor %vm341_vm6, %vm342_vm4 }
  0xb3   : > { %v338_v29 = vsub.f32 1.0, %v337_v26  ;;  %v364_v44 = vsel %vm363_vm8, %v334_v40, %v631_v36 }
  0xb5   : > { %v339_v34 = vmul.f32 %v642_v25, %v338_v29 }
  0xb7   : > { %v340_v39 = vadd.f32 %v642_v25, %v339_v34 }
  0xb9   : > { %v344_v42 = vsel %vm343_vm7, %v642_v25, %v340_v39 }
  0xba   : > { %v349_v43 = vsel %vm346_vm9, %v348_v41, %v344_v42 }
  0xbb   : > { %v365_v45 = vsel %vm363_vm8, %v349_v43, %v632_v38 }
  0xbc   : > { %v366_v46 = vpack.c.bf16 %v365_v45, %v364_v44 }
  0xbe   : > { %569 = vmatmul.msk.bf16.vlgmr.msra.gmra.mxu1 %vm403_vm10, %v366_v46 }
 0x13b   : > { %v416_v48 = vpop.f32.mrf.mxu1 }
 0x13c   : > { %v417_v49 = vadd.f32 %v634_v47, %v416_v48 }
 0x13e   : > { %421 = vmax.xlane.f32.xlu0 %v417_v49 }
 0x143   : > { %v418_v50 = vpop.f32.mrf.mxu1 }
 0x144   : > { %v419_v51 = vadd.f32 %v634_v47, %v418_v50 }
 0x146   : > { %423 = vmax.xlane.f32.xlu1 %v419_v51 }
 0x1b1   : > { %v422_v52 = vpop.xlane.xlu0 %421 }
 0x1b2   : > { %v425_v53 = vsub.f32 %v417_v49, %v422_v52 }
 0x1b4   : > { %v427_v54 = vmul.f32 1.442695, %v425_v53 }
 0x1b6   : > { %643 = vpow2.f32 %v427_v54 }
 0x1b9   : > { %v424_v55 = vpop.xlane.xlu1 %423 }
 0x1ba   : > { %v426_v56 = vsub.f32 %v419_v51, %v424_v55 }
 0x1bc   : > { %v644_v57 = vpop.eup %643  ;;  %v429_v58 = vmul.f32 1.442695, %v426_v56 }
 0x1bd   : > { %431 = vadd.xlane.f32.xlu1 %v644_v57 }
 0x1be   : > { %645 = vpow2.f32 %v429_v58 }
 0x1c4   : > { %v646_v59 = vpop.eup %645 }
 0x1c5   : > { %433 = vadd.xlane.f32.xlu2 %v646_v59 }
 0x230   : > { %v432_v60 = vpop.xlane.xlu1 %431 }
 0x231   : > { %647 = vlog2.f32 %v432_v60 }
 0x237   : > { %v648_v61 = vpop.eup %647 }
 0x238   : > { %v436_v62 = vmul.f32 0.6931472, %v648_v61  ;;  %v434_v63 = vpop.xlane.xlu2 %433 }
 0x239   : > { %649 = vlog2.f32 %v434_v63 }
 0x23a   : > { %v439_v0 = vsub.f32 %v425_v53, %v436_v62 }
 0x23c   : > { %441 = vst [vmem:[%s261_s29] sm:$0xff] %v439_v0 }
 0x23f   : > { %v650_v1 = vpop.eup %649 }
 0x240   : > { %v438_v2 = vmul.f32 0.6931472, %v650_v1 }
 0x242   : > { %v440_v3 = vsub.f32 %v426_v56, %v438_v2 }
 0x244   : > { %442 = vst [vmem:[%s261_s29 + $0x8] sm:$0xff] %v440_v3 }
 0x245   : > { %678 = shalt.err (!%p675_p3)
}
 0x246   : > { %s716_s17 = smov 128   ;;  %s717_s19 = smov 8  }
 0x247   : > { %586 = dma.vmem_to_hbm [thread:$0]  (%p791_p5), %s457_s9, 256, %s459_s10, %s444_s11, %s716_s17, %s716_s17, %s717_s19  }
 0x248 PF: > { %p592_p4 = scmp.ge.s32.totalorder %s713_s24, 2  ;;  %s473_s20 = sand.u32 1, %s701_s21  }
 0x249   : > { %s474_s26 = scalar_lea.sflag [#allocation3], %s473_s20 }
 0x24a   : > { %p589_p7 = pnand %p592_p4, %p795_p6 }
 0x24c   : > { %p590_p8 = pneg %p589_p7 }
 0x24e   : > { %696 = dma.done.wait (%p590_p8), %s474_s26, 256  }
 0x24f   : > { %698 = vsyncadd (%p590_p8), %s474_s26, 4294967040  ;;  %p16_p9 = scmp.ge.s32.totalorder %s778_s27, 6   ;;  %s870_s21 = smov %s705_s22 }
 0x250   : > { %s871_s22 = smov %s709_s23  ;;  %s872_s23 = smov %s789_s30 }
 0x251   : > { %s873_s24 = smov %s778_s27  ;;  %18 = sbr.rel (!%p16_p9) target bundleno = 3 (0x3), region = 82 }
 0x256   :  { %480 = vsyncpa [#allocation3], 1 }
 0x257   :  { %482 = vsyncpa [#allocation3 + $0x1], 1 }

</bundles_post_ra>
